<compile_context>
chip_gen: v5e
topology: v5e:2x2
jax: 0.10.0
libtpu: 0.0.40
codegen_flags: <defaults>
</compile_context>

<pallas_src>
import jax
import jax.numpy as jnp
import numpy as np
from jax.experimental import pallas as pl
from jax.experimental.pallas import tpu as pltpu

HIDDEN = 3072
_SQRT2 = np.float32(np.sqrt(2.0))


def _round_up(x, m):
    return ((x + m - 1) // m) * m


def _gelu_exact(x):
    # nn.GELU() default: exact erf-based GELU (computed in f32).
    return 0.5 * x * (1.0 + jax.lax.erf(x / _SQRT2))


def ffn_kernel(x_ref, w1_ref, b1_ref, w2_ref, b2_ref, o_ref):
    k = pl.program_id(1)  # hidden (reduction) axis -- last grid dim

    # (TM, D) @ (D, TK) -> (TM, TK); bf16 operands, f32 MXU accumulation.
    h = jnp.dot(x_ref[...], w1_ref[...], preferred_element_type=jnp.float32)
    h = h + b1_ref[...]                 # (1, TK) bias, broadcast over rows (f32)
    g = _gelu_exact(h)                  # exact GELU in f32

    # (TM, TK) @ (TK, D) -> (TM, D) partial of the second matmul.
    partial = jnp.dot(
        g.astype(w2_ref.dtype), w2_ref[...], preferred_element_type=jnp.float32
    )

    @pl.when(k == 0)
    def _():
        o_ref[...] = partial            # first hidden tile: direct write (no zero-fill)

    @pl.when(k > 0)
    def _():
        o_ref[...] += partial           # accumulate into VMEM-resident output block

    @pl.when(k == pl.num_programs(1) - 1)
    def _():
        o_ref[...] += b2_ref[...]       # final bias


def feed_forward_block(x, w1, b1, w2, b2, *, tm=256):
    """x: (batch, seq, d_model).  W1: (d_model, HIDDEN), W2: (HIDDEN, d_model)
    (i.e. already transposed relative to nn.Linear.weight).  Returns x's shape/dtype."""
    B, S, D = x.shape
    M = B * S

    # Lane-dense d_model: pad to a multiple of 128 (MXU + unmasked store path).
    D_pad = _round_up(max(D, 128), 128)
    # Row tile: bounds VMEM, gives the parallel grid axis something to shard.
    TM = min(tm, _round_up(M, 8))
    M_pad = _round_up(M, TM)
    # Hidden-dim tile; shrink for large d_model so double-buffered weight tiles
    # stay within v7x's smaller VMEM.
    TK = 256 if D_pad >= 2048 else 512
    assert HIDDEN % TK == 0

    cdt = jnp.bfloat16

    x2 = jnp.pad(x.reshape(M, D).astype(cdt), ((0, M_pad - M), (0, D_pad - D)))
    w1p = jnp.pad(w1, ((0, D_pad - D), (0, 0))).astype(cdt)          # (D_pad, HIDDEN)
    w2p = jnp.pad(w2, ((0, 0), (0, D_pad - D))).astype(cdt)          # (HIDDEN, D_pad)
    b1p = b1.reshape(1, HIDDEN).astype(jnp.float32)
    b2p = jnp.pad(b2.reshape(1, D).astype(jnp.float32), ((0, 0), (0, D_pad - D)))

    grid = (M_pad // TM, HIDDEN // TK)

    cost = pl.CostEstimate(
        flops=4 * M_pad * D_pad * HIDDEN,
        transcendentals=M_pad * HIDDEN,
        bytes_accessed=(
            x2.size * 2 + w1p.size * 2 + w2p.size * 2
            + b1p.size * 4 + b2p.size * 4 + M_pad * D_pad * 4
        ),
    )

    out = pl.pallas_call(
        ffn_kernel,
        out_shape=jax.ShapeDtypeStruct((M_pad, D_pad), jnp.float32),
        grid_spec=pltpu.PrefetchScalarGridSpec(
            num_scalar_prefetch=0,
            grid=grid,
            in_specs=[
                pl.BlockSpec((TM, D_pad), lambda i, k: (i, 0)),    # x row tile
                pl.BlockSpec((D_pad, TK), lambda i, k: (0, k)),    # W1 hidden tile
                pl.BlockSpec((1, TK), lambda i, k: (0, k)),        # b1 hidden tile
                pl.BlockSpec((TK, D_pad), lambda i, k: (k, 0)),    # W2 hidden tile
                pl.BlockSpec((1, D_pad), lambda i, k: (0, 0)),     # b2 (resident)
            ],
            out_specs=pl.BlockSpec((TM, D_pad), lambda i, k: (i, 0)),  # resident acc
        ),
        compiler_params=pltpu.CompilerParams(
            dimension_semantics=("parallel", "arbitrary"),
            vmem_limit_bytes=48 * 1024 * 1024,
        ),
        cost_estimate=cost,
    )(x2, w1p, b1p, w2p, b2p)

    return out[:M, :D].reshape(B, S, D).astype(x.dtype)


def init_params(key, d_model):
    # Deterministic init mimicking nn.Linear's uniform(-1/sqrt(fan_in), +...)
    k1, k2, k3, k4 = jax.random.split(key, 4)
    bound1 = 1.0 / np.sqrt(d_model)
    bound2 = 1.0 / np.sqrt(HIDDEN)
    w1 = jax.random.uniform(k1, (d_model, HIDDEN), jnp.float32, -bound1, bound1)
    b1 = jax.random.uniform(k2, (HIDDEN,), jnp.float32, -bound1, bound1)
    w2 = jax.random.uniform(k3, (HIDDEN, d_model), jnp.float32, -bound2, bound2)
    b2 = jax.random.uniform(k4, (d_model,), jnp.float32, -bound2, bound2)
    return w1, b1, w2, b2


if __name__ == "__main__":
    key = jax.random.PRNGKey(0)
    k_x, k_p = jax.random.split(key)

    batch, seq, d_model = 2, 8, 32
    x = jax.random.normal(k_x, (batch, seq, d_model), jnp.float32)
    w1, b1, w2, b2 = init_params(k_p, d_model)

    out = feed_forward_block(x, w1, b1, w2, b2)
    out = jax.block_until_ready(out)

    # Pure-JAX f32 reference; tolerance loosened because matmuls run in bf16
    # (with f32 accumulation) inside the kernel.
    ref = jnp.dot(jax.nn.gelu(jnp.dot(x, w1) + b1, approximate=False), w2) + b2
    np.testing.assert_allclose(np.asarray(out), np.asarray(ref), rtol=2e-2, atol=2e-2)

    print("KERNEL_OK")
</pallas_src>

<mosaic_0001>
module attributes {stable_mosaic.version = 11 : i64} {
  func.func @ffn_kernel(%arg0: i32, %arg1: i32, %arg2: memref<16x128xbf16, #tpu.memory_space<vmem>>, %arg3: memref<128x512xbf16, #tpu.memory_space<vmem>>, %arg4: memref<1x512xf32, #tpu.memory_space<vmem>>, %arg5: memref<512x128xbf16, #tpu.memory_space<vmem>>, %arg6: memref<1x128xf32, #tpu.memory_space<vmem>>, %arg7: memref<16x128xf32, #tpu.memory_space<vmem>>) attributes {dimension_semantics = [#tpu.dimension_semantics<parallel>, #tpu.dimension_semantics<arbitrary>], iteration_bounds = array<i64: 1, 6>, scalar_prefetch = 0 : i64, scratch_operands = 0 : i64, tpu.core_type = #tpu.core_type<tc>, window_params = [{transform_indices = @transform_0, window_bounds = array<i64: 16, 128>}, {transform_indices = @transform_1, window_bounds = array<i64: 128, 512>}, {transform_indices = @transform_2, window_bounds = array<i64: 1, 512>}, {transform_indices = @transform_3, window_bounds = array<i64: 512, 128>}, {pipeline_mode = #tpu.pipeline_mode<synchronous>, transform_indices = @transform_4, window_bounds = array<i64: 1, 128>}, {transform_indices = @transform_5, window_bounds = array<i64: 16, 128>}]} {
    %c0 = arith.constant 0 : index
    %c0_0 = arith.constant 0 : index
    %0 = vector.load %arg2[%c0, %c0_0] : memref<16x128xbf16, #tpu.memory_space<vmem>>, vector<16x128xbf16>
    %c0_1 = arith.constant 0 : index
    %c0_2 = arith.constant 0 : index
    %1 = vector.load %arg3[%c0_1, %c0_2] : memref<128x512xbf16, #tpu.memory_space<vmem>>, vector<128x512xbf16>
    %cst = arith.constant dense<0.000000e+00> : vector<16x512xf32>
    %2 = tpu.matmul %0, %1, %cst {dimension_numbers = #tpu.dot_dimension_numbers<[1], [0], [0], [1], [0, 0, 1, 1], [], []>} : vector<16x128xbf16>, vector<128x512xbf16>, vector<16x512xf32> -> vector<16x512xf32>
    %c0_3 = arith.constant 0 : index
    %c0_4 = arith.constant 0 : index
    %3 = vector.load %arg4[%c0_3, %c0_4] : memref<1x512xf32, #tpu.memory_space<vmem>>, vector<1x512xf32>
    %4 = vector.broadcast %3 : vector<1x512xf32> to vector<16x512xf32>
    %5 = arith.addf %2, %4 : vector<16x512xf32>
    %cst_5 = arith.constant 5.000000e-01 : f32
    %6 = vector.broadcast %cst_5 : f32 to vector<16x512xf32>
    %7 = arith.mulf %6, %5 : vector<16x512xf32>
    %cst_6 = arith.constant 1.41421354 : f32
    %8 = vector.broadcast %cst_6 : f32 to vector<16x512xf32>
    %9 = arith.divf %5, %8 : vector<16x512xf32>
    %10 = math.erf %9 : vector<16x512xf32>
    %cst_7 = arith.constant 1.000000e+00 : f32
    %11 = vector.broadcast %cst_7 : f32 to vector<16x512xf32>
    %12 = arith.addf %11, %10 : vector<16x512xf32>
    %13 = arith.mulf %7, %12 : vector<16x512xf32>
    %14 = arith.truncf %13 : vector<16x512xf32> to vector<16x512xbf16>
    %c0_8 = arith.constant 0 : index
    %c0_9 = arith.constant 0 : index
    %15 = vector.load %arg5[%c0_8, %c0_9] : memref<512x128xbf16, #tpu.memory_space<vmem>>, vector<512x128xbf16>
    %cst_10 = arith.constant dense<0.000000e+00> : vector<16x128xf32>
    %16 = tpu.matmul %14, %15, %cst_10 {dimension_numbers = #tpu.dot_dimension_numbers<[1], [0], [0], [1], [0, 0, 1, 1], [], []>} : vector<16x512xbf16>, vector<512x128xbf16>, vector<16x128xf32> -> vector<16x128xf32>
    %c0_i32 = arith.constant 0 : i32
    %17 = arith.cmpi eq, %arg1, %c0_i32 : i32
    %18 = arith.extui %17 : i1 to i32
    %c0_i32_11 = arith.constant 0 : i32
    %19 = arith.cmpi ne, %18, %c0_i32_11 : i32
    scf.if %19 {
      %c0_15 = arith.constant 0 : index
      %c0_16 = arith.constant 0 : index
      %26 = vector.load %arg7[%c0_15, %c0_16] : memref<16x128xf32, #tpu.memory_space<vmem>>, vector<16x128xf32>
      tpu.vector_store %arg7[%c0_15, %c0_16], %16 {strides = array<i32>} : memref<16x128xf32, #tpu.memory_space<vmem>>, vector<16x128xf32>,
    } else {
    }
    %c0_i32_12 = arith.constant 0 : i32
    %20 = arith.cmpi sgt, %arg1, %c0_i32_12 : i32
    %21 = arith.extui %20 : i1 to i32
    %c0_i32_13 = arith.constant 0 : i32
    %22 = arith.cmpi ne, %21, %c0_i32_13 : i32
    scf.if %22 {
      %c0_15 = arith.constant 0 : index
      %c0_16 = arith.constant 0 : index
      %26 = vector.load %arg7[%c0_15, %c0_16] : memref<16x128xf32, #tpu.memory_space<vmem>>, vector<16x128xf32>
      %27 = arith.addf %26, %16 : vector<16x128xf32>
      %c0_17 = arith.constant 0 : index
      %c0_18 = arith.constant 0 : index
      %28 = vector.load %arg7[%c0_17, %c0_18] : memref<16x128xf32, #tpu.memory_space<vmem>>, vector<16x128xf32>
      tpu.vector_store %arg7[%c0_17, %c0_18], %27 {strides = array<i32>} : memref<16x128xf32, #tpu.memory_space<vmem>>, vector<16x128xf32>,
    } else {
    }
    %c5_i32 = arith.constant 5 : i32
    %23 = arith.cmpi eq, %arg1, %c5_i32 : i32
    %24 = arith.extui %23 : i1 to i32
    %c0_i32_14 = arith.constant 0 : i32
    %25 = arith.cmpi ne, %24, %c0_i32_14 : i32
    scf.if %25 {
      %c0_15 = arith.constant 0 : index
      %c0_16 = arith.constant 0 : index
      %26 = vector.load %arg7[%c0_15, %c0_16] : memref<16x128xf32, #tpu.memory_space<vmem>>, vector<16x128xf32>
      %c0_17 = arith.constant 0 : index
      %c0_18 = arith.constant 0 : index
      %27 = vector.load %arg6[%c0_17, %c0_18] : memref<1x128xf32, #tpu.memory_space<vmem>>, vector<1x128xf32>
      %28 = vector.broadcast %27 : vector<1x128xf32> to vector<16x128xf32>
      %29 = arith.addf %26, %28 : vector<16x128xf32>
      %c0_19 = arith.constant 0 : index
      %c0_20 = arith.constant 0 : index
      %30 = vector.load %arg7[%c0_19, %c0_20] : memref<16x128xf32, #tpu.memory_space<vmem>>, vector<16x128xf32>
      tpu.vector_store %arg7[%c0_19, %c0_20], %29 {strides = array<i32>} : memref<16x128xf32, #tpu.memory_space<vmem>>, vector<16x128xf32>,
    } else {
    }
    return
  }
  func.func @transform_0(%arg0: i32, %arg1: i32) -> (i32, i32) {
    %c0_i32 = arith.constant 0 : i32
    %c0_i32_0 = arith.constant 0 : i32
    return %arg0, %c0_i32 : i32, i32
  }
  func.func @transform_1(%arg0: i32, %arg1: i32) -> (i32, i32) {
    %c0_i32 = arith.constant 0 : i32
    %c0_i32_0 = arith.constant 0 : i32
    return %c0_i32, %arg1 : i32, i32
  }
  func.func @transform_2(%arg0: i32, %arg1: i32) -> (i32, i32) {
    %c0_i32 = arith.constant 0 : i32
    %c0_i32_0 = arith.constant 0 : i32
    return %c0_i32, %arg1 : i32, i32
  }
  func.func @transform_3(%arg0: i32, %arg1: i32) -> (i32, i32) {
    %c0_i32 = arith.constant 0 : i32
    %c0_i32_0 = arith.constant 0 : i32
    return %arg1, %c0_i32 : i32, i32
  }
  func.func @transform_4(%arg0: i32, %arg1: i32) -> (i32, i32) {
    %c0_i32 = arith.constant 0 : i32
    %c0_i32_0 = arith.constant 0 : i32
    %c0_i32_1 = arith.constant 0 : i32
    return %c0_i32, %c0_i32_0 : i32, i32
  }
  func.func @transform_5(%arg0: i32, %arg1: i32) -> (i32, i32) {
    %c0_i32 = arith.constant 0 : i32
    %c0_i32_0 = arith.constant 0 : i32
    return %arg0, %c0_i32 : i32, i32
  }
}

</mosaic_0001>

<bundles_post_ra>
// kernel: tpu_custom_call.1
= control target key start
LH: loop header
LB: loop body
LE: loop exit
PB: predicated region body
PF: predicated region fallthrough
CT: control target
= control target key end

     0   :  { %s2812_s0 = inlined_call_operand.hbm [shape: bf16[16,128], index: 0, kind: input, shape index: {}]   ;;  %s2813_s1 = inlined_call_operand.hbm [shape: bf16[128,3072], index: 1, kind: input, shape index: {}]   ;;  %s2814_s2 = inlined_call_operand.hbm [shape: f32[1,3072], index: 2, kind: input, shape index: {}]   ;;  %s2815_s3 = inlined_call_operand.hbm [shape: bf16[3072,128], index: 3, kind: input, shape index: {}]   ;;  %s2816_s4 = inlined_call_operand.vmem [shape: f32[1,128], index: 4, kind: input, shape index: {}]   ;;  %s2817_s5 = inlined_call_operand.hbm [shape: f32[16,128], index: 5, kind: output, shape index: {}]  }
   0x1   :  { %2822 = sst [smem:[#allocation19_spill]] %s2812_s0 }
   0x2   :  { %2823 = sst [smem:[#allocation20_spill]] %s2813_s1 }
   0x3   :  { %10 = vsyncpa [#allocation3], 0 }
   0x4   :  { %11 = vsyncpa [#allocation6], 0 }
   0x5   :  { %13 = vsyncpa [#allocation6 + $0x1], 0 }
   0x6   :  { %14 = vsyncpa [#allocation9], 0 }
   0x7   :  { %16 = vsyncpa [#allocation9 + $0x1], 0 }
   0x8   :  { %17 = vsyncpa [#allocation4], 0  ;;  %s2182_s18 = smov 0   ;;  %s2184_s19 = smov 0  }
   0x9   :  { %s2186_s20 = smov 0   ;;  %s2188_s21 = smov 0  }
   0xa   :  { %s2190_s22 = smov 0   ;;  %s2192_s23 = smov 0  }
   0xb LB: > { %2824 = sst [smem:[#allocation15_spill]] %s2128_s20  ;;  %s32_s24 = sadd.s32 1, %s2136_s22  ;;  %s2140_s23 = sphi %s2192_s23, %s23_s23   ;;  %s2136_s22 = sphi %s2190_s22, %s2852_s22   ;;  %s2132_s21 = sphi %s2188_s21, %s2851_s21   ;;  %s2128_s20 = sphi %s2186_s20, %s2847_s20   ;;  %s2124_s19 = sphi %s2184_s19, %s2850_s19   ;;  %s2120_s18 = sphi %s2182_s18, %s2849_s18  }
   0xc   : > { %2825 = sst [smem:[#allocation16_spill]] %s2140_s23  ;;  %s68_s25 = sadd.s32 1, %s2128_s20 }
   0xd   : > { %p33_p0 = scmp.ge.s32.totalorder %s32_s24, 6  ;;  %p75_p1 = scmp.ne.s32.totalorder %s2128_s20, %s2124_s19 }
   0xe   : > { %p76_p2 = scmp.eq.s32.totalorder %s2140_s23, 0  ;;  %p1849_p4 = scmp.lt.s32.totalorder %s2140_s23, 6 }
   0xf   : > { %s2854_s24 = smov (%p33_p0, %s32_s24), 0  ;;  %s224_s28 = sand.u32 1, %s2140_s23  }
  0x10   : > { %2826 = sst [smem:[#allocation17_spill]] %s2854_s24  ;;  %p2219_p3 = por %p76_p2, %p75_p1 }
  0x11   : > { %s65_s27 = ssub.s32 %s2136_s22, %s2854_s24  ;;  %s2228_s29 = sand.u32 1, %s2128_s20  }
  0x12   : > { %p66_p5 = scmp.eq.s32.totalorder %s65_s27, 0  ;;  %s1753_s30 = sshll.u32 %s2136_s22, 4 }
  0x13   : > { %s2818_s7 = sshll.u32 %s2228_s29, 8  ;;  %s2829_s1 = sld [smem:[#allocation20_spill]] }
  0x14   : > { %s2232_s6 = scalar_select %p66_p5, %s2128_s20, %s68_s25  }
  0x15   : > { %s228_s12 = scalar_lea.vmem [#allocation5], %s2818_s7  ;;  %p2244_p6 = pnand %p1849_p4, %p2219_p3 }
  0x16   : > { %2828 = sst [smem:[#allocation18_spill]] %s2232_s6  ;;  %s236_s13 = sshll.u32 %s228_s12, 4  ;;  %s237_s13 = int_to_ptr.vmem [resolvable:$true] %s236_s13 }
  0x17   : > { %s2248_s15 = scalar_lea.sflag [#allocation6], %s224_s28  ;;  %s2142_s16 = smov 1536  }
  0x18   : > { %s2143_s17 = smov 256   ;;  %s2144_s25 = smov 16  }
  0x19   : > { %s233_s10 = scalar_lea.hbm %s2829_s1, %s1753_s30  ;;  %s2254_s27 = sadd.s32 4294967295, %s2140_s23  }
  0x1a   : > { %s234_s11 = sshll.u32 %s233_s10, 4  ;;  %p81_p7 = scmp.ne.s32.totalorder %s2124_s19, %s2120_s18  ;;  %s235_s11 = int_to_ptr.hbm [resolvable:$true] %s234_s11 }
  0x1b   : > { %1841 = dma.hbm_to_vmem [thread:$0]  (!%p2244_p6), %s235_s11, 4096, %s237_s13, %s2248_s15, %s2142_s16, %s2143_s17, %s2144_s25  }
  0x1c   : > { %p82_p8 = scmp.eq.s32.totalorder %s2254_s27, 0  ;;  %p1462_p9 = scmp.ge.s32.totalorder %s2140_s23, 1 }
  0x1d   : > { %p191_p10 = scmp.lt.s32.totalorder %s2140_s23, 7  ;;  %s2832_s0 = sld [smem:[#allocation19_spill]] }
  0x1e   : > { %p2263_p11 = por %p82_p8, %p81_p7  ;;  %s2145_s18 = smov [#allocation2]  }
  0x1f   : > { %p2270_p12 = pnand %p1462_p9, %p191_p10  ;;  %s207_s10 = sshll.u32 %s2145_s18, 4  ;;  %s208_s10 = int_to_ptr.vmem [resolvable:$true] %s207_s10 }
  0x20   : > { %s1468_s11 = sshll.u32 %s2228_s29, 2  ;;  %s1469_s12 = sshll.u32 %s2136_s22, 2 }
  0x21   : > { %p1834_p13 = pneg %p2270_p12  ;;  %s254_s17 = scalar_lea.hbm %s2814_s2, %s1469_s12 }
  0x22   : > { %s2146_s25 = smov 64   ;;  %s2147_s28 = smov 4  }
  0x23   : > { %s205_s8 = sshll.u32 %s2832_s0, 4  ;;  %p1835_p0 = pnand %p1834_p13, %p82_p8  ;;  %s206_s8 = int_to_ptr.hbm [resolvable:$true] %s205_s8 }
  0x24   : > { %s256_s30 = sshll.u32 %s254_s17, 4  ;;  %s250_s7 = scalar_lea.vmem [#allocation7], %s1468_s11  ;;  %s257_s30 = int_to_ptr.hbm [resolvable:$true] %s256_s30 }
  0x25   : > { %1837 = dma.hbm_to_vmem [thread:$0]  (!%p1835_p0), %s206_s8, 128, %s208_s10, [#allocation3], %s2146_s25, %s2146_s25, %s2147_s28  }
  0x26   : > { %s258_s0 = sshll.u32 %s250_s7, 4  ;;  %s1754_s18 = sshll.u32 %s2136_s22, 8  ;;  %s259_s0 = int_to_ptr.vmem [resolvable:$true] %s258_s0 }
  0x27   : > { %1844 = dma.hbm_to_vmem [thread:$0]  (!%p2244_p6), %s257_s30, 64, %s259_s0, %s2248_s15  }
  0x28   : > { %s2834_s1 = sshll.u32 %s2228_s29, 8  ;;  %s274_s12 = scalar_lea.hbm %s2815_s3, %s1754_s18 }
  0x29   : > { %s269_s24 = scalar_lea.vmem [#allocation8], %s2834_s1  ;;  %s275_s13 = sshll.u32 %s274_s12, 4  ;;  %s276_s13 = int_to_ptr.hbm [resolvable:$true] %s275_s13 }
  0x2a   : > { %s277_s6 = sshll.u32 %s269_s24, 4  ;;  %s266_s16 = scalar_lea.sflag [#allocation9], %s2228_s29  ;;  %s278_s6 = int_to_ptr.vmem [resolvable:$true] %s277_s6 }
  0x2b   : > { %1847 = dma.hbm_to_vmem [thread:$0]  (!%p2244_p6), %s276_s13, 4096, %s278_s6, %s266_s16, %s2146_s25, %s2146_s25, %s2147_s28  }
  0x2c   : > { %289 = sbr.rel (%p2270_p12) target bundleno = 495 (0x1ef), region = 40 }
  0x31   : > { %2103 = dma.done.wait (%p82_p8), [#allocation3], 128  }
  0x32   : > { %2105 = vsyncadd (%p82_p8), [#allocation3], 4294967168  ;;  %s296_s0 = sand.u32 1, %s2254_s27   ;;  %s298_s1 = sand.u32 1, %s2124_s19  }
  0x33   : > { %s1475_s20 = sshll.u32 %s298_s1, 8  ;;  %s297_s23 = scalar_lea.sflag [#allocation6], %s296_s0 }
  0x34   : > { %s2303_s24 = scalar_lea.vmem [#allocation5], %s1475_s20 }
  0x35   : > { %2107 = dma.done.wait (%p2263_p11), %s297_s23, 4160  }
  0x36   : > { %2109 = vsyncadd (%p2263_p11), %s297_s23, 4294963136  ;;  %s1476_s29 = sshll.u32 %s298_s1, 2  ;;  %s317_s7 = scalar_lea.sflag [#allocation9], %s298_s1 }
  0x37   : > { %s2309_s6 = scalar_lea.vmem [#allocation7], %s1476_s29  ;;  %s2311_s14 = scalar_lea.vmem [#allocation8], %s1475_s20 }
  0x38   : > { %2111 = dma.done.wait (%p2263_p11), %s317_s7, 4096  }
  0x39   : > { %2113 = vsyncadd (%p2263_p11), %s317_s7, 4294963200  ;;  %v1596_v0 = vld [vmem:[%s2303_s24 + $0xe0] sm:$0xf]  ;;  %v1786_v1 = vld [vmem:[%s2303_s24 + $0xec] sm:$0xf0]  ;;  %p1746_p1 = scmp.ne.s32.totalorder %s2132_s21, 0 }
  0x3a   : > { %v1784_v2 = vld [vmem:[%s2303_s24 + $0xe4] sm:$0xf]  ;;  %v1597_v3 = vor.u32 %v1786_v1, %v1596_v0  ;;  %v1598_v4 = vld [vmem:[%s2303_s24 + $0xf0] sm:$0xf0]  ;;  %v1604_v5 = vld [vmem:[%s2303_s24 + $0xe8] sm:$0xf] }
  0x3b   : > { %v1787_v6 = vld [vmem:[%s2303_s24 + $0xf4] sm:$0xf0]  ;;  %v1601_v7 = vor.u32 %v1784_v2, %v1598_v4  ;;  %v1785_v9 = vld [vmem:[%s2303_s24 + $0xec] sm:$0xf]  ;;  %v1606_v10 = vld [vmem:[%s2303_s24 + $0xf8] sm:$0xf0] }
  0x3c   : > { %v1605_v8 = vor.u32 %v1787_v6, %v1604_v5  ;;  %v1580_v11 = vld [vmem:[%s2303_s24 + $0xc0] sm:$0xf]  ;;  %568 = vmatpush.bf16.msra.mxu0 %v1597_v3  ;;  %v1609_v12 = vor.u32 %v1785_v9, %v1606_v10  ;;  %v1782_v13 = vld [vmem:[%s2303_s24 + $0xcc] sm:$0xf0]  ;;  %v1780_v14 = vld [vmem:[%s2303_s24 + $0xc4] sm:$0xf] }
  0x3d   : > { %v1582_v15 = vld [vmem:[%s2303_s24 + $0xd0] sm:$0xf0]  ;;  %582 = vmatpush.bf16.msra.mxu1 %v1601_v7  ;;  %v1581_v16 = vor.u32 %v1782_v13, %v1580_v11  ;;  %v1588_v18 = vld [vmem:[%s2303_s24 + $0xc8] sm:$0xf]  ;;  %v1783_v19 = vld [vmem:[%s2303_s24 + $0xd4] sm:$0xf0] }
  0x3e   : > { %596 = vmatpush.bf16.msra.mxu2 %v1605_v8  ;;  %v1585_v17 = vor.u32 %v1780_v14, %v1582_v15  ;;  %v1781_v20 = vld [vmem:[%s2303_s24 + $0xcc] sm:$0xf]  ;;  %610 = vmatpush.bf16.msra.mxu3 %v1609_v12  ;;  %v1589_v21 = vor.u32 %v1783_v19, %v1588_v18  ;;  %v1590_v22 = vld [vmem:[%s2303_s24 + $0xd8] sm:$0xf0]  ;;  %v1564_v23 = vld [vmem:[%s2303_s24 + $0xa0] sm:$0xf] }
  0x3f   : > { %v1778_v24 = vld [vmem:[%s2303_s24 + $0xac] sm:$0xf0]  ;;  %v1593_v25 = vor.u32 %v1781_v20, %v1590_v22  ;;  %v1776_v26 = vld [vmem:[%s2303_s24 + $0xa4] sm:$0xf]  ;;  %v1566_v27 = vld [vmem:[%s2303_s24 + $0xb0] sm:$0xf0] }
  0x40   : > { %v1572_v28 = vld [vmem:[%s2303_s24 + $0xa8] sm:$0xf]  ;;  %569 = vmatpush.bf16.msra.mxu0 %v1581_v16  ;;  %v1565_v29 = vor.u32 %v1778_v24, %v1564_v23  ;;  %v1779_v30 = vld [vmem:[%s2303_s24 + $0xb4] sm:$0xf0]  ;;  %v1777_v31 = vld [vmem:[%s2303_s24 + $0xac] sm:$0xf]  ;;  %v1569_v33 = vor.u32 %v1776_v26, %v1566_v27 }
  0x41   : > { %v1574_v32 = vld [vmem:[%s2303_s24 + $0xb8] sm:$0xf0]  ;;  %583 = vmatpush.bf16.msra.mxu1 %v1585_v17  ;;  %v1573_v34 = vor.u32 %v1779_v30, %v1572_v28  ;;  %v1548_v35 = vld [vmem:[%s2303_s24 + $0x80] sm:$0xf]  ;;  %v1774_v36 = vld [vmem:[%s2303_s24 + $0x8c] sm:$0xf0] }
  0x42   : > { %597 = vmatpush.bf16.msra.mxu2 %v1589_v21  ;;  %v1772_v37 = vld [vmem:[%s2303_s24 + $0x84] sm:$0xf]  ;;  %611 = vmatpush.bf16.msra.mxu3 %v1593_v25  ;;  %v1577_v38 = vor.u32 %v1777_v31, %v1574_v32  ;;  %v1550_v39 = vld [vmem:[%s2303_s24 + $0x90] sm:$0xf0]  ;;  %v1556_v40 = vld [vmem:[%s2303_s24 + $0x88] sm:$0xf]  ;;  %v1549_v44 = vor.u32 %v1774_v36, %v1548_v35 }
  0x43   : > { %v1775_v41 = vld [vmem:[%s2303_s24 + $0x94] sm:$0xf0]  ;;  %v1773_v42 = vld [vmem:[%s2303_s24 + $0x8c] sm:$0xf]  ;;  %v1558_v43 = vld [vmem:[%s2303_s24 + $0x98] sm:$0xf0]  ;;  %v1553_v45 = vor.u32 %v1772_v37, %v1550_v39 }
  0x44   : > { %570 = vmatpush.bf16.msra.mxu0 %v1565_v29  ;;  %v1557_v46 = vor.u32 %v1775_v41, %v1556_v40  ;;  %v1532_v47 = vld [vmem:[%s2303_s24 + $0x60] sm:$0xf]  ;;  %v1770_v48 = vld [vmem:[%s2303_s24 + $0x6c] sm:$0xf0]  ;;  %v1768_v49 = vld [vmem:[%s2303_s24 + $0x64] sm:$0xf]  ;;  %v1561_v50 = vor.u32 %v1773_v42, %v1558_v43 }
  0x45   : > { %584 = vmatpush.bf16.msra.mxu1 %v1569_v33  ;;  %v1534_v51 = vld [vmem:[%s2303_s24 + $0x70] sm:$0xf0]  ;;  %v1540_v52 = vld [vmem:[%s2303_s24 + $0x68] sm:$0xf]  ;;  %v1771_v53 = vld [vmem:[%s2303_s24 + $0x74] sm:$0xf0]  ;;  %v1533_v56 = vor.u32 %v1770_v48, %v1532_v47 }
  0x46   : > { %598 = vmatpush.bf16.msra.mxu2 %v1573_v34  ;;  %612 = vmatpush.bf16.msra.mxu3 %v1577_v38  ;;  %v1769_v54 = vld [vmem:[%s2303_s24 + $0x6c] sm:$0xf]  ;;  %v1542_v55 = vld [vmem:[%s2303_s24 + $0x78] sm:$0xf0]  ;;  %v1537_v57 = vor.u32 %v1768_v49, %v1534_v51  ;;  %v1541_v58 = vor.u32 %v1771_v53, %v1540_v52  ;;  %v1516_v59 = vld [vmem:[%s2303_s24 + $0x40] sm:$0xf] }
  0x47   : > { %v1766_v60 = vld [vmem:[%s2303_s24 + $0x4c] sm:$0xf0]  ;;  %v1764_v61 = vld [vmem:[%s2303_s24 + $0x44] sm:$0xf]  ;;  %v1545_v62 = vor.u32 %v1769_v54, %v1542_v55  ;;  %v1518_v63 = vld [vmem:[%s2303_s24 + $0x50] sm:$0xf0] }
  0x48   : > { %571 = vmatpush.bf16.msra.mxu0 %v1549_v44  ;;  %v1524_v0 = vld [vmem:[%s2303_s24 + $0x48] sm:$0xf]  ;;  %v1767_v1 = vld [vmem:[%s2303_s24 + $0x54] sm:$0xf0]  ;;  %v1765_v2 = vld [vmem:[%s2303_s24 + $0x4c] sm:$0xf]  ;;  %v1517_v4 = vor.u32 %v1766_v60, %v1516_v59  ;;  %v1521_v5 = vor.u32 %v1764_v61, %v1518_v63 }
  0x49   : > { %585 = vmatpush.bf16.msra.mxu1 %v1553_v45  ;;  %v1526_v3 = vld [vmem:[%s2303_s24 + $0x58] sm:$0xf0]  ;;  %v1525_v6 = vor.u32 %v1767_v1, %v1524_v0  ;;  %v1500_v7 = vld [vmem:[%s2303_s24 + $0x20] sm:$0xf]  ;;  %v1762_v8 = vld [vmem:[%s2303_s24 + $0x2c] sm:$0xf0] }
  0x4a   : > { %599 = vmatpush.bf16.msra.mxu2 %v1557_v46  ;;  %613 = vmatpush.bf16.msra.mxu3 %v1561_v50  ;;  %v1760_v9 = vld [vmem:[%s2303_s24 + $0x24] sm:$0xf]  ;;  %v1529_v10 = vor.u32 %v1765_v2, %v1526_v3  ;;  %v1502_v11 = vld [vmem:[%s2303_s24 + $0x30] sm:$0xf0]  ;;  %v1508_v12 = vld [vmem:[%s2303_s24 + $0x28] sm:$0xf]  ;;  %v1501_v16 = vor.u32 %v1762_v8, %v1500_v7 }
  0x4b   : > { %v1763_v13 = vld [vmem:[%s2303_s24 + $0x34] sm:$0xf0]  ;;  %v1761_v14 = vld [vmem:[%s2303_s24 + $0x2c] sm:$0xf]  ;;  %v1510_v15 = vld [vmem:[%s2303_s24 + $0x38] sm:$0xf0]  ;;  %v1505_v17 = vor.u32 %v1760_v9, %v1502_v11 }
  0x4c   : > { %572 = vmatpush.bf16.msra.mxu0 %v1533_v56  ;;  %v1509_v18 = vor.u32 %v1763_v13, %v1508_v12  ;;  %v1484_v19 = vld [vmem:[%s2303_s24] sm:$0xf]  ;;  %v1758_v20 = vld [vmem:[%s2303_s24 + $0xc] sm:$0xf0]  ;;  %v1756_v21 = vld [vmem:[%s2303_s24 + $0x4] sm:$0xf]  ;;  %v1513_v22 = vor.u32 %v1761_v14, %v1510_v15 }
  0x4d   : > { %586 = vmatpush.bf16.msra.mxu1 %v1537_v57  ;;  %v1486_v23 = vld [vmem:[%s2303_s24 + $0x10] sm:$0xf0]  ;;  %v1492_v24 = vld [vmem:[%s2303_s24 + $0x8] sm:$0xf]  ;;  %v1759_v25 = vld [vmem:[%s2303_s24 + $0x14] sm:$0xf0]  ;;  %v1485_v28 = vor.u32 %v1758_v20, %v1484_v19 }
  0x4e   : > { %600 = vmatpush.bf16.msra.mxu2 %v1541_v58  ;;  %614 = vmatpush.bf16.msra.mxu3 %v1545_v62  ;;  %v1757_v26 = vld [vmem:[%s2303_s24 + $0xc] sm:$0xf]  ;;  %v1494_v27 = vld [vmem:[%s2303_s24 + $0x18] sm:$0xf0]  ;;  %v1489_v29 = vor.u32 %v1756_v21, %v1486_v23  ;;  %v1493_v30 = vor.u32 %v1759_v25, %v1492_v24  ;;  %v2148_v33 = vmov 1.4142135  }
  0x4f   : > { %v1497_v31 = vor.u32 %v1757_v26, %v1494_v27  ;;  %v1755_v32 = vld [vmem:[#allocation2] sm:$0xff]  ;;  %1911 = vrcp.f32 %v2148_v33  ;;  %v2382_v38 = vld [vmem:[%s2309_s6] sm:$0xf] }
  0x50   : > { %573 = vmatpush.bf16.msra.mxu0 %v1517_v4  ;;  %v394_v40 = vperm.slane %v2382_v38, 0  ;;  %v395_v41 = vperm.slane %v2382_v38, 1  ;;  %v396_v49 = vperm.slane %v2382_v38, 2  ;;  %v397_v51 = vperm.slane %v2382_v38, 3 }
  0x51   : > { %587 = vmatpush.bf16.msra.mxu1 %v1521_v5 }
  0x52   : > { %601 = vmatpush.bf16.msra.mxu2 %v1525_v6  ;;  %615 = vmatpush.bf16.msra.mxu3 %v1529_v10 }
  0x54   : > { %574 = vmatpush.bf16.msra.mxu0 %v1501_v16 }
  0x55   : > { %588 = vmatpush.bf16.msra.mxu1 %v1505_v17  ;;  %v1912_v34 = vpop.eup %1911 }
  0x56   : > { %602 = vmatpush.bf16.msra.mxu2 %v1509_v18  ;;  %616 = vmatpush.bf16.msra.mxu3 %v1513_v22  ;;  %v633_v35 = vmul.f32 1.4142135, %v1912_v34  ;;  %vm637_vm0 = vweird.f32 %v1912_v34 }
  0x58   : > { %575 = vmatpush.bf16.msra.mxu0 %v1485_v28  ;;  %v634_v36 = vsub.f32 1.0, %v633_v35 }
  0x59   : > { %589 = vmatpush.bf16.msra.mxu1 %v1489_v29 }
  0x5a   : > { %603 = vmatpush.bf16.msra.mxu2 %v1493_v30  ;;  %617 = vmatpush.bf16.msra.mxu3 %v1497_v31  ;;  %v635_v37 = vmul.f32 %v1912_v34, %v634_v36 }
  0x5b   : > { %576 = vmatmul.bf16.vlgmr.msra.gmra.mxu0 %v1755_v32 }
  0x5c   : > { %590 = vmatmul.bf16.vlgmr.msra.gmra.mxu1 %v1755_v32  ;;  %v636_v39 = vadd.f32 %v1912_v34, %v635_v37 }
  0x5d   : > { %604 = vmatmul.bf16.vlgmr.msra.gmra.mxu2 %v1755_v32  ;;  %618 = vmatmul.bf16.vlgmr.msra.gmra.mxu3 %v1755_v32 }
  0x5e   : > { %v2386_v43 = vsel %vm637_vm0, %v1912_v34, %v636_v39 }
  0xd8   : > { %v577_v42 = vpop.f32.mrf.mxu0 }
  0xd9   : > { %v2388_v44 = vadd.f32 %v577_v42, %v394_v40  ;;  %v591_v45 = vpop.f32.mrf.mxu1 }
  0xda   : > { %v2392_v46 = vadd.f32 %v591_v45, %v395_v41 }
  0xdb   : > { %v2396_v47 = vmul.f32 %v2386_v43, %v2388_v44 }
  0xdc   : > { %v2400_v48 = vmul.f32 %v2386_v43, %v2392_v46 }
  0xdd   : > { %v647_v50 = vmul.f32 %v2396_v47, %v2396_v47 }
  0xde   : > { %v687_v52 = vmul.f32 %v2400_v48, %v2400_v48 }
  0xdf   : > { %v2408_v53 = vmin.f32 %v647_v50, 16.0 }
  0xe0   : > { %v605_v54 = vpop.f32.mrf.mxu2  ;;  %v2410_v55 = vmin.f32 %v687_v52, 16.0  ;;  %v619_v57 = vpop.f32.mrf.mxu3 }
  0xe1   : > { %v2414_v56 = vadd.f32 %v605_v54, %v396_v49  ;;  %v660_v58 = vmul.f32 3.8918573e-05, %v2408_v53  ;;  %v2419_v59 = vadd.f32 %v619_v57, %v397_v51  ;;  %v649_v62 = vmul.f32 2.1237322e-06, %v2408_v53  ;;  %v579_v15 = vpop.f32.mrf.mxu0  ;;  %v593_v35 = vpop.f32.mrf.mxu1 }
  0xe2   : > { %v700_v60 = vmul.f32 3.8918573e-05, %v2410_v55  ;;  %v689_v1 = vmul.f32 2.1237322e-06, %v2410_v55  ;;  %v2449_v24 = vadd.f32 %v579_v15, %v394_v40  ;;  %v2469_v52 = vadd.f32 %v593_v35, %v395_v41 }
  0xe3   : > { %v2424_v61 = vmul.f32 %v2386_v43, %v2414_v56  ;;  %v661_v63 = vadd.f32 0.001143296, %v660_v58  ;;  %v2429_v0 = vmul.f32 %v2386_v43, %v2419_v59  ;;  %v650_v7 = vadd.f32 0.00028619796, %v649_v62 }
  0xe4   : > { %v701_v2 = vadd.f32 0.001143296, %v700_v60  ;;  %v690_v10 = vadd.f32 0.00028619796, %v689_v1  ;;  %v2456_v33 = vmul.f32 %v2386_v43, %v2449_v24 }
  0xe5   : > { %v727_v3 = vmul.f32 %v2424_v61, %v2424_v61  ;;  %v662_v4 = vmul.f32 %v661_v63, %v2408_v53  ;;  %v767_v9 = vmul.f32 %v2429_v0, %v2429_v0  ;;  %v651_v16 = vmul.f32 %v650_v7, %v2408_v53 }
  0xe6   : > { %v702_v5 = vmul.f32 %v701_v2, %v2410_v55  ;;  %v691_v20 = vmul.f32 %v690_v10, %v2410_v55  ;;  %v807_v50 = vmul.f32 %v2456_v33, %v2456_v33 }
  0xe7   : > { %v2436_v6 = vmin.f32 %v727_v3, 16.0  ;;  %v663_v8 = vadd.f32 0.014752088, %v662_v4  ;;  %v2444_v19 = vmin.f32 %v767_v9, 16.0  ;;  %v652_v26 = vadd.f32 0.0036580483, %v651_v16 }
  0xe8   : > { %v703_v11 = vadd.f32 0.014752088, %v702_v5  ;;  %v692_v29 = vadd.f32 0.0036580483, %v691_v20  ;;  %v2476_v2 = vmin.f32 %v807_v50, 16.0  ;;  %v2480_v3 = vmul.f32 %v2386_v43, %v2469_v52 }
  0xe9   : > { %v664_v12 = vmul.f32 %v663_v8, %v2408_v53  ;;  %v740_v13 = vmul.f32 3.8918573e-05, %v2436_v6  ;;  %v780_v28 = vmul.f32 3.8918573e-05, %v2444_v19  ;;  %v729_v34 = vmul.f32 2.1237322e-06, %v2436_v6 }
  0xea   : > { %v704_v14 = vmul.f32 %v703_v11, %v2410_v55  ;;  %v653_v36 = vmul.f32 %v652_v26, %v2408_v53  ;;  %v693_v40 = vmul.f32 %v692_v29, %v2410_v55  ;;  %v769_v57 = vmul.f32 2.1237322e-06, %v2444_v19 }
  0xeb   : > { %v665_v17 = vadd.f32 0.112945676, %v664_v12  ;;  %v741_v18 = vadd.f32 0.001143296, %v740_v13  ;;  %v781_v37 = vadd.f32 0.001143296, %v780_v28  ;;  %v847_v12 = vmul.f32 %v2480_v3, %v2480_v3 }
  0xec   : > { %v705_v21 = vadd.f32 0.112945676, %v704_v14  ;;  %v730_v54 = vadd.f32 0.00028619796, %v729_v34  ;;  %v654_v58 = vadd.f32 0.05243302, %v653_v36 }
  0xed   : > { %v666_v22 = vmul.f32 %v665_v17, %v2408_v53  ;;  %v742_v23 = vmul.f32 %v741_v18, %v2436_v6  ;;  %v782_v60 = vmul.f32 %v781_v37, %v2444_v19  ;;  %v694_v62 = vadd.f32 0.05243302, %v693_v40 }
  0xee   : > { %v706_v25 = vmul.f32 %v705_v21, %v2410_v55  ;;  %v731_v41 = vmul.f32 %v730_v54, %v2436_v6  ;;  %v770_v4 = vadd.f32 0.00028619796, %v769_v57  ;;  %v655_v5 = vmul.f32 %v654_v58, %v2408_v53 }
  0xef   : > { %v667_v27 = vadd.f32 0.4994258, %v666_v22  ;;  %v743_v31 = vadd.f32 0.014752088, %v742_v23  ;;  %v783_v7 = vadd.f32 0.014752088, %v782_v60  ;;  %v695_v10 = vmul.f32 %v694_v62, %v2410_v55  ;;  %v607_v60 = vpop.f32.mrf.mxu2 }
  0xf0   : > { %v707_v30 = vadd.f32 0.4994258, %v706_v25  ;;  %v809_v8 = vmul.f32 2.1237322e-06, %v2476_v2  ;;  %v820_v9 = vmul.f32 3.8918573e-05, %v2476_v2  ;;  %v771_v15 = vmul.f32 %v770_v4, %v2444_v19 }
  0xf1   : > { %v668_v32 = vmul.f32 %v667_v27, %v2408_v53  ;;  %v744_v45 = vmul.f32 %v743_v31, %v2436_v6  ;;  %v732_v14 = vadd.f32 0.0036580483, %v731_v41  ;;  %v656_v17 = vadd.f32 0.18741608, %v655_v5 }
  0xf2   : > { %v708_v42 = vmul.f32 %v707_v30, %v2410_v55  ;;  %v810_v16 = vadd.f32 0.00028619796, %v809_v8  ;;  %v784_v18 = vmul.f32 %v783_v7, %v2444_v19  ;;  %v821_v20 = vadd.f32 0.001143296, %v820_v9  ;;  %v1795_v9 = vld [vmem:[%s2311_s14 + $0x38] sm:$0xff] }
  0xf3   : > { %v2460_v39 = vadd.f32 1.0, %v668_v32  ;;  %v745_v1 = vadd.f32 0.112945676, %v744_v45  ;;  %v696_v21 = vadd.f32 0.18741608, %v695_v10  ;;  %v2497_v25 = vmin.f32 %v847_v12, 16.0  ;;  %1243 = vmatpush.bf16.msrb.mxu0 %v1795_v9 }
  0xf4   : > { %v2474_v63 = vadd.f32 1.0, %v708_v42  ;;  %v733_v27 = vmul.f32 %v732_v14, %v2436_v6  ;;  %v772_v28 = vadd.f32 0.0036580483, %v771_v15  ;;  %v811_v29 = vmul.f32 %v810_v16, %v2476_v2  ;;  %v1803_v14 = vld [vmem:[%s2311_s14 + $0x78] sm:$0xff] }
  0xf5   : > { %1913 = vrcp.f32 %v2460_v39  ;;  %v746_v11 = vmul.f32 %v745_v1, %v2436_v6  ;;  %v822_v30 = vmul.f32 %v821_v20, %v2476_v2  ;;  %v657_v31 = vmul.f32 %v656_v17, %v2408_v53  ;;  %1257 = vmatpush.bf16.msrb.mxu1 %v1803_v14  ;;  %v1810_v14 = vld [vmem:[%s2311_s14 + $0xb0] sm:$0xff] }
  0xf6   : > { %1915 = vrcp.f32 %v2474_v63  ;;  %v785_v32 = vadd.f32 0.112945676, %v784_v18  ;;  %v697_v34 = vmul.f32 %v696_v21, %v2410_v55  ;;  %v812_v36 = vadd.f32 0.0036580483, %v811_v29 }
  0xf7   : > { %v747_v22 = vadd.f32 0.4994258, %v746_v11  ;;  %v823_v42 = vadd.f32 0.014752088, %v822_v30  ;;  %v849_v45 = vmul.f32 2.1237322e-06, %v2497_v25  ;;  %v773_v54 = vmul.f32 %v772_v28, %v2444_v19 }
  0xf8   : > { %v734_v50 = vadd.f32 0.05243302, %v733_v27  ;;  %v2512_v57 = vmul.f32 0.5, %v2388_v44  ;;  %v658_v53 = vadd.f32 1.1283791, %v657_v31  ;;  %v786_v55 = vmul.f32 %v785_v32, %v2444_v19  ;;  %v1802_v27 = vld [vmem:[%s2311_s14 + $0x70] sm:$0xff] }
  0xf9   : > { %v748_v35 = vmul.f32 %v747_v22, %v2436_v6  ;;  %v813_v58 = vmul.f32 %v812_v36, %v2476_v2  ;;  %v2517_v62 = vmul.f32 0.5, %v2449_v24  ;;  %v824_v1 = vmul.f32 %v823_v42, %v2476_v2  ;;  %v1819_v42 = vld [vmem:[%s2311_s14 + $0xf8] sm:$0xff]  ;;  %1258 = vmatpush.bf16.msrb.mxu1 %v1802_v27 }
  0xfa   : > { %v850_v41 = vadd.f32 0.00028619796, %v849_v45  ;;  %v860_v4 = vmul.f32 3.8918573e-05, %v2497_v25  ;;  %v698_v7 = vadd.f32 1.1283791, %v697_v34  ;;  %v735_v10 = vmul.f32 %v734_v50, %v2436_v6  ;;  %1285 = vmatpush.bf16.msrb.mxu3 %v1819_v42 }
  0xfb   : > { %v2491_v13 = vpop.eup %1913  ;;  %v2522_v8 = vadd.f32 1.0, %v748_v35  ;;  %v774_v11 = vadd.f32 0.05243302, %v773_v54  ;;  %v825_v12 = vadd.f32 0.112945676, %v824_v1  ;;  %v2528_v24 = vadd.f32 %v607_v60, %v396_v49  ;;  %v1801_v60 = vld [vmem:[%s2311_s14 + $0x68] sm:$0xff] }
  0xfc   : > { %v671_v23 = vmul.f32 %v2491_v13, %v2460_v39  ;;  %v2499_v26 = vpop.eup %1915  ;;  %v2532_v15 = vmul.f32 %v658_v53, %v2396_v47  ;;  %v787_v16 = vadd.f32 0.4994258, %v786_v55  ;;  %v814_v17 = vadd.f32 0.05243302, %v813_v58  ;;  %v1793_v58 = vld [vmem:[%s2311_s14 + $0x28] sm:$0xff]  ;;  %v1791_v45 = vld [vmem:[%s2311_s14 + $0x18] sm:$0xff] }
  0xfd   : > { %v711_v40 = vmul.f32 %v2499_v26, %v2474_v63  ;;  %v851_v18 = vmul.f32 %v850_v41, %v2497_v25  ;;  %vm675_vm1 = vweird.f32 %v2460_v39  ;;  %v679_v20 = vand.u32 2147483647, %v2460_v39  ;;  %1259 = vmatpush.bf16.msrb.mxu1 %v1801_v60 }
  0xfe   : > { %v672_v37 = vsub.f32 1.0, %v671_v23  ;;  %v826_v21 = vmul.f32 %v825_v12, %v2476_v2  ;;  %v861_v22 = vadd.f32 0.001143296, %v860_v4  ;;  %vm676_vm2 = vweird.f32 %v2491_v13  ;;  %v1794_v23 = vld [vmem:[%s2311_s14 + $0x30] sm:$0xff] }
  0xff   : > { %v712_v44 = vsub.f32 1.0, %v711_v40  ;;  %1917 = vrcp.f32 %v2522_v8  ;;  %v681_v28 = vand.u32 2147483648, %v2460_v39  ;;  %v2548_v31 = vmul.f32 %v2386_v43, %v2528_v24  ;;  %1244 = vmatpush.bf16.msrb.mxu0 %v1794_v23  ;;  %v1811_v40 = vld [vmem:[%s2311_s14 + $0xb8] sm:$0xff]  ;;  %vm2561_vm3 = vmor %vm675_vm1, %vm676_vm2  ;;  %v1800_v23 = vld [vmem:[%s2311_s14 + $0x60] sm:$0xff] }
 0x100   : > { %v673_v5 = vmul.f32 %v2491_v13, %v672_v37  ;;  %v827_v29 = vadd.f32 0.4994258, %v826_v21  ;;  %v862_v30 = vmul.f32 %v861_v22, %v2497_v25  ;;  %v2551_v32 = vmul.f32 %v698_v7, %v2400_v48  ;;  %v621_v37 = vpop.f32.mrf.mxu3  ;;  %1271 = vmatpush.bf16.msrb.mxu2 %v1811_v40 }
 0x101   : > { %v713_v47 = vmul.f32 %v2499_v26, %v712_v44  ;;  %v788_v34 = vmul.f32 %v787_v16, %v2444_v19  ;;  %v815_v35 = vmul.f32 %v814_v17, %v2476_v2  ;;  %v852_v36 = vadd.f32 0.0036580483, %v851_v18  ;;  %v1818_v16 = vld [vmem:[%s2311_s14 + $0xf0] sm:$0xff]  ;;  %1260 = vmatpush.bf16.msrb.mxu1 %v1800_v23 }
 0x102   : > { %v674_v49 = vadd.f32 %v2491_v13, %v673_v5  ;;  %vm715_vm4 = vweird.f32 %v2474_v63  ;;  %v719_v48 = vand.u32 2147483647, %v2474_v63  ;;  %v828_v50 = vmul.f32 %v827_v29, %v2476_v2  ;;  %1286 = vmatpush.bf16.msrb.mxu3 %v1818_v16  ;;  %v1809_v29 = vld [vmem:[%s2311_s14 + $0xa8] sm:$0xff] }
 0x103   : > { %v863_v54 = vadd.f32 0.014752088, %v862_v30  ;;  %v714_v55 = vadd.f32 %v2499_v26, %v713_v47  ;;  %vm716_vm5 = vweird.f32 %v2499_v26  ;;  %v721_v39 = vand.u32 2147483648, %v2474_v63  ;;  %1245 = vmatpush.bf16.msrb.mxu0 %v1793_v58  ;;  %v1792_v47 = vld [vmem:[%s2311_s14 + $0x20] sm:$0xff]  ;;  %v1817_v30 = vld [vmem:[%s2311_s14 + $0xe8] sm:$0xff] }
 0x104   : > { %v678_v53 = vsel %vm2561_vm3, %v2491_v13, %v674_v49  ;;  %v2576_v1 = vadd.f32 1.0, %v828_v50  ;;  %v887_v4 = vmul.f32 %v2548_v31, %v2548_v31  ;;  %v2583_v13 = vadd.f32 %v621_v37, %v397_v51  ;;  %vm2598_vm7 = vmor %vm715_vm4, %vm716_vm5  ;;  %1272 = vmatpush.bf16.msrb.mxu2 %v1810_v14 }
 0x105   : > { %v864_v41 = vmul.f32 %v863_v54, %v2497_v25  ;;  %v2585_v5 = vpop.eup %1917  ;;  %v682_v7 = vor.u32 1.1754944e-38, %v681_v28  ;;  %v2587_v44 = vadd.f32 1.0, %v788_v34  ;;  %v816_v9 = vadd.f32 0.18741608, %v815_v35 }
 0x106   : > { %v853_v12 = vmul.f32 %v852_v36, %v2497_v25  ;;  %vm680_vm6 = vcmp.eq.f32.partialorder %v679_v20, 8.507059e+37  ;;  %v736_v17 = vadd.f32 0.18741608, %v735_v10  ;;  %v775_v18 = vmul.f32 %v774_v11, %v2444_v19  ;;  %1287 = vmatpush.bf16.msrb.mxu3 %v1817_v30 }
 0x107   : > { %1919 = vrcp.f32 %v2576_v1  ;;  %v683_v38 = vsel %vm680_vm6, %v682_v7, %v678_v53  ;;  %vm2602_vm8 = vcmp.eq.f32.partialorder %v719_v48, 8.507059e+37  ;;  %v722_v10 = vor.u32 1.1754944e-38, %v721_v39  ;;  %1246 = vmatpush.bf16.msrb.mxu0 %v1792_v47  ;;  %v1799_v48 = vld [vmem:[%s2311_s14 + $0x58] sm:$0xff]  ;;  %v1816_v7 = vld [vmem:[%s2311_s14 + $0xe0] sm:$0xff] }
 0x108   : > { %v865_v11 = vadd.f32 0.112945676, %v864_v41  ;;  %v718_v21 = vsel %vm2598_vm7, %v2499_v26, %v714_v55  ;;  %v2611_v63 = vmul.f32 %v2585_v5, %v2522_v8  ;;  %v2613_v22 = vmin.f32 %v887_v4, 16.0  ;;  %1273 = vmatpush.bf16.msrb.mxu2 %v1809_v29  ;;  %v1808_v4 = vld [vmem:[%s2311_s14 + $0xa0] sm:$0xff]  ;;  %1261 = vmatpush.bf16.msrb.mxu1 %v1799_v48 }
 0x109   : > { %v2617_v49 = vmul.f32 %v2386_v43, %v2583_v13  ;;  %1921 = vrcp.f32 %v2587_v44  ;;  %v817_v27 = vmul.f32 %v816_v9, %v2476_v2  ;;  %v854_v28 = vadd.f32 0.05243302, %v853_v12 }
 0x10a   : > { %v866_v26 = vmul.f32 %v865_v11, %v2497_v25  ;;  %v2626_v34 = vadd.f32 0.18741608, %v775_v18  ;;  %v889_v35 = vmul.f32 2.1237322e-06, %v2613_v22  ;;  %v900_v43 = vmul.f32 3.8918573e-05, %v2613_v22  ;;  %1288 = vmatpush.bf16.msrb.mxu3 %v1816_v7 }
 0x10b   : > { %v927_v36 = vmul.f32 %v2617_v49, %v2617_v49  ;;  %v2633_v2 = vmul.f32 %v683_v38, %v2532_v15  ;;  %v723_v37 = vsel %vm2602_vm8, %v722_v10, %v718_v21  ;;  %v759_v40 = vand.u32 2147483647, %v2522_v8  ;;  %1247 = vmatpush.bf16.msrb.mxu0 %v1791_v45  ;;  %v1790_v11 = vld [vmem:[%s2311_s14 + $0x10] sm:$0xff] }
 0x10c   : > { %v867_v42 = vadd.f32 0.4994258, %v866_v26  ;;  %v752_v54 = vsub.f32 1.0, %v2611_v63  ;;  %v890_v53 = vadd.f32 0.00028619796, %v889_v35  ;;  %v855_v60 = vmul.f32 %v854_v28, %v2497_v25  ;;  %1274 = vmatpush.bf16.msrb.mxu2 %v1808_v4  ;;  %v1798_v21 = vld [vmem:[%s2311_s14 + $0x50] sm:$0xff] }
 0x10d   : > { %v2640_v50 = vpop.eup %1919  ;;  %v901_v55 = vadd.f32 0.001143296, %v900_v43  ;;  %v2643_v15 = vmin.f32 %v927_v36, 16.0  ;;  %v818_v39 = vadd.f32 1.1283791, %v817_v27  ;;  %v2658_v38 = vmul.f32 %v736_v17, %v2436_v6  ;;  %v1807_v28 = vld [vmem:[%s2311_s14 + $0x98] sm:$0xff]  ;;  %1262 = vmatpush.bf16.msrb.mxu1 %v1798_v21 }
 0x10e   : > { %v831_v58 = vmul.f32 %v2640_v50, %v2576_v1  ;;  %v868_v41 = vmul.f32 %v867_v42, %v2497_v25  ;;  %v839_v9 = vand.u32 2147483647, %v2576_v1  ;;  %v891_v12 = vmul.f32 %v890_v53, %v2613_v22  ;;  %v1815_v26 = vld [vmem:[%s2311_s14 + $0xd8] sm:$0xff]  ;;  %v1797_v42 = vld [vmem:[%s2311_s14 + $0x48] sm:$0xff] }
 0x10f   : > { %v902_v14 = vmul.f32 %v901_v55, %v2613_v22  ;;  %v929_v16 = vmul.f32 2.1237322e-06, %v2643_v15  ;;  %v2655_v18 = vpop.eup %1921  ;;  %v940_v10 = vmul.f32 3.8918573e-05, %v2643_v15  ;;  %v2666_v63 = vmul.f32 %v723_v37, %v2551_v32  ;;  %1248 = vmatpush.bf16.msrb.mxu0 %v1790_v11  ;;  %1289 = vmatpush.bf16.msrb.mxu3 %v1815_v26 }
 0x110   : > { %v832_v51 = vsub.f32 1.0, %v831_v58  ;;  %v2660_v20 = vadd.f32 1.0, %v868_v41  ;;  %v841_v47 = vand.u32 2147483648, %v2576_v1  ;;  %vm836_vm9 = vweird.f32 %v2640_v50  ;;  %1275 = vmatpush.bf16.msrb.mxu2 %v1807_v28  ;;  %v1813_v28 = vld [vmem:[%s2311_s14 + $0xc8] sm:$0xff] }
 0x111   : > { %v903_v23 = vadd.f32 0.014752088, %v902_v14  ;;  %v930_v27 = vadd.f32 0.00028619796, %v929_v16  ;;  %v892_v17 = vadd.f32 0.0036580483, %v891_v12  ;;  %v2677_v32 = vmul.f32 %v2655_v18, %v2587_v44  ;;  %1263 = vmatpush.bf16.msrb.mxu1 %v1797_v42 }
 0x112   : > { %v833_v6 = vmul.f32 %v2640_v50, %v832_v51  ;;  %1923 = vrcp.f32 %v2660_v20  ;;  %v1610_v29 = vclamps-f32 %v2633_v2, 1.0  ;;  %v856_v30 = vadd.f32 0.18741608, %v855_v60  ;;  %v1789_v2 = vld [vmem:[%s2311_s14 + $0x8] sm:$0xff]  ;;  %v1806_v60 = vld [vmem:[%s2311_s14 + $0x90] sm:$0xff]  ;;  %v1788_v16 = vld [vmem:[%s2311_s14] sm:$0xff] }
 0x113   : > { %v904_v35 = vmul.f32 %v903_v23, %v2613_v22  ;;  %v753_v43 = vmul.f32 %v2585_v5, %v752_v54  ;;  %vm835_vm10 = vweird.f32 %v2576_v1  ;;  %v941_v37 = vadd.f32 0.001143296, %v940_v10  ;;  %1249 = vmatpush.bf16.msrb.mxu0 %v1789_v2  ;;  %v1796_v51 = vld [vmem:[%s2311_s14 + $0x40] sm:$0xff] }
 0x114   : > { %v834_v36 = vadd.f32 %v2640_v50, %v833_v6  ;;  %v819_v45 = vmul.f32 %v818_v39, %v2456_v33  ;;  %vm837_vm11 = vmor %vm835_vm10, %vm836_vm9  ;;  %v842_v48 = vor.u32 1.1754944e-38, %v841_v47  ;;  %v931_v54 = vmul.f32 %v930_v27, %v2643_v15  ;;  %v1814_v33 = vld [vmem:[%s2311_s14 + $0xd0] sm:$0xff]  ;;  %1276 = vmatpush.bf16.msrb.mxu2 %v1806_v60 }
 0x115   : > { %v905_v53 = vadd.f32 0.112945676, %v904_v35  ;;  %vm755_vm12 = vweird.f32 %v2522_v8  ;;  %vm840_vm13 = vcmp.eq.f32.partialorder %v839_v9, 8.507059e+37  ;;  %v893_v55 = vmul.f32 %v892_v17, %v2613_v22  ;;  %1290 = vmatpush.bf16.msrb.mxu3 %v1814_v33  ;;  %v1805_v17 = vld [vmem:[%s2311_s14 + $0x88] sm:$0xff]  ;;  %1264 = vmatpush.bf16.msrb.mxu1 %v1796_v51 }
 0x116   : > { %v838_v1 = vsel %vm837_vm11, %v2640_v50, %v834_v36  ;;  %v942_v58 = vmul.f32 %v941_v37, %v2643_v15  ;;  %v761_v39 = vand.u32 2147483648, %v2522_v8  ;;  %v857_v4 = vmul.f32 %v856_v30, %v2497_v25 }
 0x117   : > { %v843_v41 = vsel %vm840_vm13, %v842_v48, %v838_v1  ;;  %v906_v7 = vmul.f32 %v905_v53, %v2613_v22  ;;  %v1611_v50 = vclamps-f32 %v2666_v63, 1.0  ;;  %vm756_vm14 = vweird.f32 %v2585_v5  ;;  %1250 = vmatpush.bf16.msrb.mxu0 %v1788_v16 }
 0x118   : > { %v1924_v12 = vpop.eup %1923  ;;  %v844_v9 = vmul.f32 %v843_v41, %v819_v45  ;;  %v943_v14 = vadd.f32 0.014752088, %v942_v58  ;;  %v967_v10 = vadd.f32 1.0, %v1610_v29  ;;  %v932_v21 = vadd.f32 0.0036580483, %v931_v54  ;;  %1277 = vmatpush.bf16.msrb.mxu2 %v1805_v17  ;;  %v1812_v58 = vld [vmem:[%s2311_s14 + $0xc0] sm:$0xff]  ;;  %vm2724_vm0 = vmor %vm755_vm12, %vm756_vm14 }
 0x119   : > { %v871_v25 = vmul.f32 %v1924_v12, %v2660_v20  ;;  %v907_v11 = vadd.f32 0.4994258, %v906_v7  ;;  %v792_v47 = vsub.f32 1.0, %v2677_v32  ;;  %v894_v27 = vadd.f32 0.05243302, %v893_v55  ;;  %1291 = vmatpush.bf16.msrb.mxu3 %v1813_v28  ;;  %v1804_v55 = vld [vmem:[%s2311_s14 + $0x80] sm:$0xff] }
 0x11a   : > { %v1614_v23 = vclamps-f32 %v844_v9, 1.0  ;;  %v944_v6 = vmul.f32 %v943_v14, %v2643_v15  ;;  %v754_v26 = vadd.f32 %v2585_v5, %v753_v43  ;;  %v858_v30 = vadd.f32 1.1283791, %v857_v4 }
 0x11b   : > { %v872_v35 = vsub.f32 1.0, %v871_v25  ;;  %v908_v36 = vmul.f32 %v907_v11, %v2613_v22  ;;  %v879_v37 = vand.u32 2147483647, %v2660_v20  ;;  %v881_v32 = vand.u32 2147483648, %v2660_v20 }
 0x11c   : > { %v971_v29 = vadd.f32 1.0, %v1614_v23  ;;  %v945_v2 = vadd.f32 0.112945676, %v944_v6  ;;  %vm876_vm15 = vweird.f32 %v1924_v12  ;;  %v933_v43 = vmul.f32 %v932_v21, %v2643_v15  ;;  %1278 = vmatpush.bf16.msrb.mxu2 %v1804_v55 }
 0x11d   : > { %v873_v42 = vmul.f32 %v1924_v12, %v872_v35  ;;  %v2711_v45 = vadd.f32 1.0, %v908_v36  ;;  %v975_v48 = vmul.f32 %v967_v10, %v2512_v57  ;;  %v895_v54 = vmul.f32 %v894_v27, %v2613_v22  ;;  %1292 = vmatpush.bf16.msrb.mxu3 %v1812_v58 }
 0x11e   : > { %v979_v53 = vmul.f32 %v971_v29, %v2517_v62  ;;  %v946_v1 = vmul.f32 %v945_v2, %v2643_v15  ;;  %v793_v33 = vmul.f32 %v2655_v18, %v792_v47  ;;  %vm875_vm1 = vweird.f32 %v2660_v20 }
 0x11f   : > { %v874_v41 = vadd.f32 %v1924_v12, %v873_v42  ;;  %1925 = vrcp.f32 %v2711_v45  ;;  %v758_v57 = vsel %vm2724_vm0, %v2585_v5, %v754_v26  ;;  %v859_v62 = vmul.f32 %v858_v30, %v2480_v3  ;;  %vm877_vm2 = vmor %vm875_vm1, %vm876_vm15 }
 0x120   : > { %v882_v4 = vor.u32 1.1754944e-38, %v881_v32  ;;  %v947_v7 = vadd.f32 0.4994258, %v946_v1  ;;  %vm880_vm3 = vcmp.eq.f32.partialorder %v879_v37, 8.507059e+37  ;;  %v934_v14 = vadd.f32 0.05243302, %v933_v43 }
 0x121   : > { %v878_v9 = vsel %vm877_vm2, %v1924_v12, %v874_v41  ;;  %v983_v16 = vpack.c.bf16 %v979_v53, %v975_v48  ;;  %v738_v20 = vadd.f32 1.1283791, %v2658_v38  ;;  %v762_v51 = vor.u32 1.1754944e-38, %v761_v39 }
 0x122   : > { %v883_v10 = vsel %vm880_vm3, %v882_v4, %v878_v9  ;;  %v896_v25 = vadd.f32 0.18741608, %v895_v54  ;;  %v625_v5 = vmul.f32 0.5, %v2392_v46  ;;  %vm760_vm4 = vcmp.eq.f32.partialorder %v759_v40, 8.507059e+37 }
 0x123   : > { %v884_v3 = vmul.f32 %v883_v10, %v859_v62  ;;  %v948_v11 = vmul.f32 %v947_v7, %v2643_v15  ;;  %1251 = vmatmul.bf16.vlgmr.msrb.gmra.mxu0 %v983_v16  ;;  %v968_v12 = vadd.f32 1.0, %v1611_v50  ;;  %v763_v21 = vsel %vm760_vm4, %v762_v51, %v758_v57 }
 0x124   : > { %vm796_vm5 = vweird.f32 %v2655_v18  ;;  %v629_v38 = vmul.f32 0.5, %v2469_v52  ;;  %v794_v47 = vadd.f32 %v2655_v18, %v793_v33  ;;  %v935_v46 = vmul.f32 %v934_v14, %v2643_v15 }
 0x125   : > { %v1926_v39 = vpop.eup %1925  ;;  %v1615_v23 = vclamps-f32 %v884_v3, 1.0  ;;  %v2749_v8 = vadd.f32 1.0, %v948_v11  ;;  %v739_v40 = vmul.f32 %v738_v20, %v2424_v61  ;;  %v777_v27 = vmul.f32 %v2626_v34, %v2444_v19 }
 0x126   : > { %v897_v63 = vmul.f32 %v896_v25, %v2613_v22  ;;  %v911_v50 = vmul.f32 %v1926_v39, %v2711_v45  ;;  %vm795_vm6 = vweird.f32 %v2587_v44  ;;  %v801_v52 = vand.u32 2147483648, %v2587_v44 }
 0x127   : > { %v972_v6 = vadd.f32 1.0, %v1615_v23  ;;  %1927 = vrcp.f32 %v2749_v8  ;;  %v976_v17 = vmul.f32 %v968_v12, %v625_v5  ;;  %v764_v28 = vmul.f32 %v763_v21, %v739_v40  ;;  %vm2761_vm7 = vmor %vm795_vm6, %vm796_vm5 }
 0x128   : > { %v799_v19 = vand.u32 2147483647, %v2587_v44  ;;  %v912_v22 = vsub.f32 1.0, %v911_v50  ;;  %v798_v34 = vsel %vm2761_vm7, %v2655_v18, %v794_v47  ;;  %v921_v30 = vand.u32 2147483648, %v2711_v45 }
 0x129   : > { %v980_v26 = vmul.f32 %v972_v6, %v629_v38  ;;  %v936_v35 = vadd.f32 0.18741608, %v935_v46  ;;  %v898_v36 = vadd.f32 1.1283791, %v897_v63  ;;  %vm916_vm8 = vweird.f32 %v1926_v39 }
 0x12a   : > { %v913_v29 = vmul.f32 %v1926_v39, %v912_v22  ;;  %v919_v37 = vand.u32 2147483647, %v2711_v45  ;;  %v778_v32 = vadd.f32 1.1283791, %v777_v27  ;;  %v802_v2 = vor.u32 1.1754944e-38, %v801_v52 }
 0x12b   : > { %v984_v42 = vpack.c.bf16 %v980_v26, %v976_v17  ;;  %vm800_vm9 = vcmp.eq.f32.partialorder %v799_v19, 8.507059e+37  ;;  %vm915_vm10 = vweird.f32 %v2711_v45  ;;  %v1612_v48 = vclamps-f32 %v764_v28, 1.0 }
 0x12c   : > { %v914_v43 = vadd.f32 %v1926_v39, %v913_v29  ;;  %v803_v53 = vsel %vm800_vm9, %v802_v2, %v798_v34  ;;  %vm917_vm11 = vmor %vm915_vm10, %vm916_vm8  ;;  %v922_v18 = vor.u32 1.1754944e-38, %v921_v30  ;;  %v937_v54 = vmul.f32 %v936_v35, %v2643_v15 }
 0x12d   : > { %v1928_v44 = vpop.eup %1927  ;;  %1265 = vmatmul.bf16.vlgmr.msrb.gmra.mxu1 %v984_v42  ;;  %v899_v1 = vmul.f32 %v898_v36, %v2548_v31  ;;  %vm920_vm12 = vcmp.eq.f32.partialorder %v919_v37, 8.507059e+37  ;;  %v779_v60 = vmul.f32 %v778_v32, %v2429_v0  ;;  %v969_v45 = vadd.f32 1.0, %v1612_v48 }
 0x12e   : > { %v918_v55 = vsel %vm917_vm11, %v1926_v39, %v914_v43  ;;  %v951_v58 = vmul.f32 %v1928_v44, %v2749_v8  ;;  %v938_v4 = vadd.f32 1.1283791, %v937_v54  ;;  %v961_v7 = vand.u32 2147483648, %v2749_v8 }
 0x12f   : > { %v923_v33 = vsel %vm920_vm12, %v922_v18, %v918_v55  ;;  %v804_v62 = vmul.f32 %v803_v53, %v779_v60  ;;  %vm956_vm13 = vweird.f32 %v1928_v44  ;;  %v959_v15 = vand.u32 2147483647, %v2749_v8 }
 0x130   : > { %v924_v41 = vmul.f32 %v923_v33, %v899_v1  ;;  %v952_v57 = vsub.f32 1.0, %v951_v58  ;;  %v626_v31 = vmul.f32 0.5, %v2414_v56  ;;  %v630_v16 = vmul.f32 0.5, %v2528_v24 }
 0x131   : > { %vm955_vm14 = vweird.f32 %v2749_v8  ;;  %v1613_v10 = vclamps-f32 %v804_v62, 1.0  ;;  %v962_v25 = vor.u32 1.1754944e-38, %v961_v7  ;;  %v939_v3 = vmul.f32 %v938_v4, %v2617_v49 }
 0x132   : > { %v1616_v9 = vclamps-f32 %v924_v41, 1.0  ;;  %v953_v14 = vmul.f32 %v1928_v44, %v952_v57  ;;  %v977_v0 = vmul.f32 %v969_v45, %v626_v31  ;;  %vm957_vm15 = vmor %vm955_vm14, %vm956_vm13  ;;  %vm960_vm0 = vcmp.eq.f32.partialorder %v959_v15, 8.507059e+37 }
 0x133   : > { %v970_v39 = vadd.f32 1.0, %v1613_v10  ;;  %v627_v24 = vmul.f32 0.5, %v2419_v59  ;;  %v631_v47 = vmul.f32 0.5, %v2583_v13 }
 0x134   : > { %v973_v20 = vadd.f32 1.0, %v1616_v9  ;;  %v954_v51 = vadd.f32 %v1928_v44, %v953_v14 }
 0x135   : > { %v978_v46 = vmul.f32 %v970_v39, %v627_v24 }
 0x136   : > { %v981_v5 = vmul.f32 %v973_v20, %v630_v16  ;;  %v958_v11 = vsel %vm957_vm15, %v1928_v44, %v954_v51 }
 0x137   : > { %v963_v12 = vsel %vm960_vm0, %v962_v25, %v958_v11 }
 0x138   : > { %v964_v21 = vmul.f32 %v963_v12, %v939_v3  ;;  %v985_v38 = vpack.c.bf16 %v981_v5, %v977_v0 }
 0x13a   : > { %v1617_v56 = vclamps-f32 %v964_v21, 1.0  ;;  %1279 = vmatmul.bf16.vlgmr.msrb.gmra.mxu2 %v985_v38 }
 0x13c   : > { %v974_v23 = vadd.f32 1.0, %v1617_v56 }
 0x13e   : > { %v982_v8 = vmul.f32 %v974_v23, %v631_v47 }
 0x140   : > { %v986_v40 = vpack.c.bf16 %v982_v8, %v978_v46 }
 0x142   : > { %1293 = vmatmul.bf16.vlgmr.msrb.gmra.mxu3 %v986_v40 }
 0x1a0   : > { %v1252_v27 = vpop.f32.mrf.mxu0 }
 0x1a8   : > { %v1254_v6 = vpop.f32.mrf.mxu0 }
 0x1aa   : > { %v1266_v63 = vpop.f32.mrf.mxu1 }
 0x1ab   : > { %v1267_v50 = vadd.f32 %v1266_v63, %v1252_v27 }
 0x1b2   : > { %v1268_v17 = vpop.f32.mrf.mxu1 }
 0x1b3   : > { %v1269_v22 = vadd.f32 %v1268_v17, %v1254_v6 }
 0x1bd   : > { %v1280_v49 = vpop.f32.mrf.mxu2 }
 0x1be   : > { %v1281_v52 = vadd.f32 %v1280_v49, %v1267_v50 }
 0x1c5   : > { %v1294_v28 = vpop.f32.mrf.mxu3  ;;  %v1282_v19 = vpop.f32.mrf.mxu2 }
 0x1c6   : > { %v1295_v61 = vadd.f32 %v1294_v28, %v1281_v52  ;;  %v1283_v34 = vadd.f32 %v1282_v19, %v1269_v22 }
 0x1ca   : > { %1302 = sbr.rel (%p1746_p1) target bundleno = 465 (0x1d1), region = 60 }
 0x1cd   : > { %v1296_v59 = vpop.f32.mrf.mxu3 }
 0x1ce   : > { %v1297_v26 = vadd.f32 %v1296_v59, %v1283_v34 }
 0x1cf   : > { %1303 = vst [vmem:[#allocation10] sm:$0xff] %v1295_v61 }
 0x1d0   : > { %1304 = vst [vmem:[#allocation10 + $0x8] sm:$0xff] %v1297_v26 }
 0x1d1 PF: > { %p1747_p2 = scmp.le.s32.totalorder %s2132_s21, 0 }
 0x1d3   : > { %1308 = sbr.rel (%p1747_p2) target bundleno = 477 (0x1dd), region = 64 }
 0x1d8   : > { %v1309_v13 = vld [vmem:[#allocation10] sm:$0xff]  ;;  %v1310_v30 = vld [vmem:[#allocation10 + $0x8] sm:$0xff] }
 0x1d9   : > { %v1311_v35 = vadd.f32 %v1309_v13, %v1295_v61  ;;  %v1312_v36 = vadd.f32 %v1310_v30, %v1297_v26 }
 0x1db   : > { %1313 = vst [vmem:[#allocation10] sm:$0xff] %v1311_v35 }
 0x1dc   : > { %1314 = vst [vmem:[#allocation10 + $0x8] sm:$0xff] %v1312_v36 }
 0x1dd PF: > { %p1748_p3 = scmp.ne.s32.totalorder %s2132_s21, 5 }
 0x1df   : > { %1318 = sbr.rel (%p1748_p3) target bundleno = 489 (0x1e9), region = 68 }
 0x1e4   : > { %v1319_v29 = vld [vmem:[#allocation10] sm:$0xff]  ;;  %v1929_v37 = vld [vmem:[%s2816_s4] ss:$0 sm:$0xff]  ;;  %v1320_v32 = vld [vmem:[#allocation10 + $0x8] sm:$0xff] }
 0x1e5   : > { %v1325_v2 = vadd.f32 %v1929_v37, %v1319_v29  ;;  %v1326_v42 = vadd.f32 %v1929_v37, %v1320_v32 }
 0x1e7   : > { %1327 = vst [vmem:[#allocation10] sm:$0xff] %v1325_v2 }
 0x1e8   : > { %1328 = vst [vmem:[#allocation10 + $0x8] sm:$0xff] %v1326_v42 }
 0x1e9 PF: > { %p1851_p4 = scmp.eq.s32.totalorder %s2254_s27, 5  ;;  %s1339_s10 = sshll.u32 %s2817_s5, 4  ;;  %s1340_s10 = int_to_ptr.hbm [resolvable:$true] %s1339_s10 }
 0x1ea   : > { %s2149_s11 = smov [#allocation10]   ;;  %s2150_s17 = smov 128  }
 0x1eb   : > { %s1337_s21 = sshll.u32 %s2149_s11, 4  ;;  %s2151_s25 = smov 8   ;;  %s1338_s21 = int_to_ptr.vmem [resolvable:$true] %s1337_s21 }
 0x1ec   : > { %1831 = dma.vmem_to_hbm [thread:$0]  (%p1851_p4), %s1338_s21, 256, %s1340_s10, [#allocation4], %s2150_s17, %s2150_s17, %s2151_s25  }
 0x1ed   : > { %2115 = dma.done.wait (%p1851_p4), [#allocation4], 256  }
 0x1ee   : > { %2117 = vsyncadd (%p1851_p4), [#allocation4], 4294967040 }
 0x1ef PF: > { %s2845_s28 = sld [smem:[#allocation16_spill]]  ;;  %s2849_s18 = smov %s2124_s19 }
 0x1f0   : > { %s2846_s30 = sld [smem:[#allocation15_spill]]  ;;  %s2851_s21 = smov %s2136_s22 }
 0x1f1   : > { %s2847_s20 = sld [smem:[#allocation18_spill]] }
 0x1f2   : > { %s2848_s27 = sld [smem:[#allocation17_spill]] }
 0x1f5   : > { %s23_s23 = sadd.s32 1, %s2845_s28  }
 0x1f6   : > { %p20_p5 = scmp.ge.s32.totalorder %s23_s23, 8   ;;  %s2850_s19 = smov %s2846_s30 }
 0x1f8   : > { %s2852_s22 = smov %s2848_s27  ;;  %22 = sbr.rel (!%p20_p5) target bundleno = 11 (0xb), region = 120 }
 0x1fd   :  { %1356 = vsyncpa [#allocation3], 1 }
 0x1fe   :  { %1358 = vsyncpa [#allocation3 + $0x1], 1 }
 0x1ff   :  { %1359 = vsyncpa [#allocation6], 1 }
 0x200   :  { %1361 = vsyncpa [#allocation6 + $0x1], 1 }
 0x201   :  { %1362 = vsyncpa [#allocation9], 1 }
 0x202   :  { %1364 = vsyncpa [#allocation9 + $0x1], 1 }
 0x203   :  { %1365 = vsyncpa [#allocation4], 1 }
 0x204   :  { %1367 = vsyncpa [#allocation4 + $0x1], 1 }

</bundles_post_ra>
